<compile_context>
chip_gen: v5e
topology: v5e:2x2
jax: 0.10.0
libtpu: 0.0.40
codegen_flags: <defaults>
</compile_context>

<pallas_src>
import functools

import jax
import jax.numpy as jnp
from jax.experimental import pallas as pl
from jax.experimental.pallas import tpu as pltpu

_GROUP = 128             # batch rows per view-row
_LANES = 3 * _GROUP      # 384 lanes: [b0c0 b0c1 b0c2 b1c0 ... b127c2]


def _fuzzy_kernel(x_ref, cls_ref, scale_ref, bias_ref, o_ref):
    # x_ref / o_ref : (tR, 384) blocks; lane l holds class (l % 3) of batch row
    #                 (view_row * 128 + l // 3).
    # cls_ref / scale_ref / bias_ref : (1, 384) f32 rows, broadcast on sublanes.
    x = x_ref[...].astype(jnp.float32)
    n = x.shape[-1]                                   # 384 (static)

    # Static lane rotations (XLU slot, cheap): neighbours within the row.
    nxt1 = pltpu.roll(x, n - 1, 1)                    # x[:, l+1]
    nxt2 = pltpu.roll(x, n - 2, 1)                    # x[:, l+2]
    prv1 = pltpu.roll(x, 1, 1)                        # x[:, l-1]
    prv2 = pltpu.roll(x, 2, 1)                        # x[:, l-2]

    cls = cls_ref[...]                                # 0,1,2,0,1,2,... pattern
    is0 = cls == 0.0
    is1 = cls == 1.0

    # The other two members of this lane's 3-class triple.  Wrapped-around roll
    # values are never selected (class-0 lanes only use nxt*, class-2 only prv*).
    a = jnp.where(is0, nxt1, prv1)
    b = jnp.where(is0, nxt2, jnp.where(is1, nxt1, prv2))

    # Numerically stable 3-way softmax, whole-block ops only.
    m = jnp.maximum(x, jnp.maximum(a, b))
    ex = jnp.exp(x - m)
    s = ex + jnp.exp(a - m) + jnp.exp(b - m)
    p = ex * pl.reciprocal(s, approx=False)

    # Per-class affine epilogue as a single whole-block FMA with lane-pattern
    # scale/bias rows (sublane broadcast).
    o_ref[...] = (p * scale_ref[...] + bias_ref[...]).astype(o_ref.dtype)


@functools.partial(jax.jit, static_argnames=("tile_rows",))
def fuzzy_logic_layer(logits: jax.Array, weights: jax.Array, *, tile_rows: int = 1024) -> jax.Array:
    """logits: (B, 3); weights: (3,) (the nn.Parameter). Returns (B, 3) float32."""
    B, C = logits.shape
    assert C == 3, "FuzzyLogicLayer expects 3 classes"

    # Fold membership-function constants and permuted weights into scale/bias.
    # Output columns [false, partial, true] multiply weights [w2, w1, w0].
    w = weights.astype(jnp.float32)
    scale3 = w[::-1] * jnp.array([1.0 / 0.15, 1.0 / 0.25, 1.0 / 0.15], jnp.float32)
    bias3 = -jnp.array([0.0, 0.25, 0.70], jnp.float32) * scale3
    scale_row = jnp.tile(scale3, _GROUP).reshape(1, _LANES)
    bias_row = jnp.tile(bias3, _GROUP).reshape(1, _LANES)
    cls_row = jnp.tile(jnp.arange(3, dtype=jnp.float32), _GROUP).reshape(1, _LANES)

    # 128-aligned batches take the zero-copy path; others pay one small row pad
    # (needed to form the contiguous 384-lane view).
    Bp = pl.cdiv(B, _GROUP) * _GROUP
    x = logits if Bp == B else jnp.pad(logits, ((0, Bp - B), (0, 0)))
    R = Bp // _GROUP
    x2 = x.reshape(R, _LANES)                        # free contiguous reshape

    if R <= tile_rows:
        tR = R                                       # single full-array block
    else:
        tR = max(8, (tile_rows // 8) * 8)            # keep sublane dim 8-aligned
    grid = (pl.cdiv(R, tR),)                         # ragged last block is masked

    out2 = pl.pallas_call(
        _fuzzy_kernel,
        out_shape=jax.ShapeDtypeStruct((R, _LANES), jnp.float32),
        grid=grid,
        in_specs=[
            pl.BlockSpec((tR, _LANES), lambda i: (i, 0)),   # logits view
            pl.BlockSpec((1, _LANES), lambda i: (0, 0)),    # class ids
            pl.BlockSpec((1, _LANES), lambda i: (0, 0)),    # scale row
            pl.BlockSpec((1, _LANES), lambda i: (0, 0)),    # bias row
        ],
        out_specs=pl.BlockSpec((tR, _LANES), lambda i: (i, 0)),
        compiler_params=pltpu.CompilerParams(
            dimension_semantics=("parallel",),
            vmem_limit_bytes=32 * 1024 * 1024,
        ),
    )(x2, cls_row, scale_row, bias_row)

    out = out2.reshape(Bp, 3)                        # free contiguous reshape
    return out if Bp == B else out[:B]


def _reference(logits, weights):
    probs = jax.nn.softmax(logits.astype(jnp.float32), axis=1)
    true_score = (probs[:, 2] - 0.7) / (0.85 - 0.7) * weights[0]
    false_score = (probs[:, 0] - 0.0) / (0.15 - 0.0) * weights[2]
    partial_score = (probs[:, 1] - 0.25) / (0.5 - 0.25) * weights[1]
    return jnp.stack([false_score, partial_score, true_score], axis=1)


if __name__ == "__main__":
    key = jax.random.PRNGKey(0)

    # Deterministic parameter init, exactly as in the module's __init__.
    weights = jnp.array([10.0, 10.0, 10.0], dtype=jnp.float32)

    # Small demo batch (pads 8 -> 128 rows internally, single (1, 384) block).
    B = 8
    logits = jax.random.normal(key, (B, 3), dtype=jnp.float32)
    out = jax.block_until_ready(fuzzy_logic_layer(logits, weights))
    ref = _reference(logits, weights)
    assert out.shape == (B, 3) and out.dtype == jnp.float32
    assert jnp.allclose(out, ref, atol=5e-4, rtol=1e-4), (out, ref)

    # Distinct weights so the w[::-1] permutation is actually validated;
    # 128-aligned batch -> zero-copy path, single block.
    weights2 = jnp.array([1.5, 2.0, 3.0], dtype=jnp.float32)
    B2 = 640
    logits2 = jax.random.normal(jax.random.PRNGKey(1), (B2, 3), dtype=jnp.float32)
    out2 = jax.block_until_ready(fuzzy_logic_layer(logits2, weights2))
    assert out2.shape == (B2, 3)
    assert jnp.allclose(out2, _reference(logits2, weights2), atol=5e-4, rtol=1e-4)

    # Non-128-aligned batch with a small tile to force a multi-step grid and a
    # ragged (masked) final block.
    B3 = 2100
    logits3 = jax.random.normal(jax.random.PRNGKey(2), (B3, 3), dtype=jnp.float32)
    out3 = jax.block_until_ready(fuzzy_logic_layer(logits3, weights2, tile_rows=8))
    assert out3.shape == (B3, 3)
    assert jnp.allclose(out3, _reference(logits3, weights2), atol=5e-4, rtol=1e-4)

    print("KERNEL_OK")
</pallas_src>

<mosaic_0001>
module attributes {stable_mosaic.version = 11 : i64} {
  func.func @_fuzzy_kernel(%arg0: i32, %arg1: memref<1x384xf32, #tpu.memory_space<vmem>>, %arg2: memref<1x384xf32, #tpu.memory_space<vmem>>, %arg3: memref<1x384xf32, #tpu.memory_space<vmem>>, %arg4: memref<1x384xf32, #tpu.memory_space<vmem>>, %arg5: memref<1x384xf32, #tpu.memory_space<vmem>>) attributes {dimension_semantics = [#tpu.dimension_semantics<parallel>], iteration_bounds = array<i64: 1>, scalar_prefetch = 0 : i64, scratch_operands = 0 : i64, tpu.core_type = #tpu.core_type<tc>, window_params = [{transform_indices = @transform_0, window_bounds = array<i64: 1, 384>}, {pipeline_mode = #tpu.pipeline_mode<synchronous>, transform_indices = @transform_1, window_bounds = array<i64: 1, 384>}, {pipeline_mode = #tpu.pipeline_mode<synchronous>, transform_indices = @transform_2, window_bounds = array<i64: 1, 384>}, {pipeline_mode = #tpu.pipeline_mode<synchronous>, transform_indices = @transform_3, window_bounds = array<i64: 1, 384>}, {transform_indices = @transform_4, window_bounds = array<i64: 1, 384>}]} {
    %c0 = arith.constant 0 : index
    %c0_0 = arith.constant 0 : index
    %0 = vector.load %arg1[%c0, %c0_0] : memref<1x384xf32, #tpu.memory_space<vmem>>, vector<1x384xf32>
    %c383_i32 = arith.constant 383 : i32
    %1 = tpu.dynamic_rotate %0 by %c383_i32 dim 1 : vector<1x384xf32>, i32 -> vector<1x384xf32>
    %c382_i32 = arith.constant 382 : i32
    %2 = tpu.dynamic_rotate %0 by %c382_i32 dim 1 : vector<1x384xf32>, i32 -> vector<1x384xf32>
    %c1_i32 = arith.constant 1 : i32
    %3 = tpu.dynamic_rotate %0 by %c1_i32 dim 1 : vector<1x384xf32>, i32 -> vector<1x384xf32>
    %c2_i32 = arith.constant 2 : i32
    %4 = tpu.dynamic_rotate %0 by %c2_i32 dim 1 : vector<1x384xf32>, i32 -> vector<1x384xf32>
    %c0_1 = arith.constant 0 : index
    %c0_2 = arith.constant 0 : index
    %5 = vector.load %arg2[%c0_1, %c0_2] : memref<1x384xf32, #tpu.memory_space<vmem>>, vector<1x384xf32>
    %cst = arith.constant 0.000000e+00 : f32
    %6 = vector.broadcast %cst : f32 to vector<1x384xf32>
    %7 = arith.cmpf oeq, %5, %6 : vector<1x384xf32>
    %cst_3 = arith.constant 1.000000e+00 : f32
    %8 = vector.broadcast %cst_3 : f32 to vector<1x384xf32>
    %9 = arith.cmpf oeq, %5, %8 : vector<1x384xf32>
    %10 = arith.select %7, %1, %3 : vector<1x384xi1>, vector<1x384xf32>
    %11 = arith.select %9, %1, %4 : vector<1x384xi1>, vector<1x384xf32>
    %12 = arith.select %7, %2, %11 : vector<1x384xi1>, vector<1x384xf32>
    %13 = arith.maximumf %10, %12 : vector<1x384xf32>
    %14 = arith.maximumf %0, %13 : vector<1x384xf32>
    %15 = arith.subf %0, %14 : vector<1x384xf32>
    %16 = math.exp %15 : vector<1x384xf32>
    %17 = arith.subf %10, %14 : vector<1x384xf32>
    %18 = math.exp %17 : vector<1x384xf32>
    %19 = arith.addf %16, %18 : vector<1x384xf32>
    %20 = arith.subf %12, %14 : vector<1x384xf32>
    %21 = math.exp %20 : vector<1x384xf32>
    %22 = arith.addf %19, %21 : vector<1x384xf32>
    %23 = tpu.reciprocal %22 : vector<1x384xf32> -> vector<1x384xf32>
    %24 = arith.mulf %16, %23 : vector<1x384xf32>
    %c0_4 = arith.constant 0 : index
    %c0_5 = arith.constant 0 : index
    %25 = vector.load %arg3[%c0_4, %c0_5] : memref<1x384xf32, #tpu.memory_space<vmem>>, vector<1x384xf32>
    %26 = arith.mulf %24, %25 : vector<1x384xf32>
    %c0_6 = arith.constant 0 : index
    %c0_7 = arith.constant 0 : index
    %27 = vector.load %arg4[%c0_6, %c0_7] : memref<1x384xf32, #tpu.memory_space<vmem>>, vector<1x384xf32>
    %28 = arith.addf %26, %27 : vector<1x384xf32>
    %c0_8 = arith.constant 0 : index
    %c0_9 = arith.constant 0 : index
    %29 = vector.load %arg5[%c0_8, %c0_9] : memref<1x384xf32, #tpu.memory_space<vmem>>, vector<1x384xf32>
    tpu.vector_store %arg5[%c0_8, %c0_9], %28 {strides = array<i32>} : memref<1x384xf32, #tpu.memory_space<vmem>>, vector<1x384xf32>,
    return
  }
  func.func @transform_0(%arg0: i32) -> (i32, i32) {
    %c0_i32 = arith.constant 0 : i32
    %c0_i32_0 = arith.constant 0 : i32
    return %arg0, %c0_i32 : i32, i32
  }
  func.func @transform_1(%arg0: i32) -> (i32, i32) {
    %c0_i32 = arith.constant 0 : i32
    %c0_i32_0 = arith.constant 0 : i32
    %c0_i32_1 = arith.constant 0 : i32
    return %c0_i32, %c0_i32_0 : i32, i32
  }
  func.func @transform_2(%arg0: i32) -> (i32, i32) {
    %c0_i32 = arith.constant 0 : i32
    %c0_i32_0 = arith.constant 0 : i32
    %c0_i32_1 = arith.constant 0 : i32
    return %c0_i32, %c0_i32_0 : i32, i32
  }
  func.func @transform_3(%arg0: i32) -> (i32, i32) {
    %c0_i32 = arith.constant 0 : i32
    %c0_i32_0 = arith.constant 0 : i32
    %c0_i32_1 = arith.constant 0 : i32
    return %c0_i32, %c0_i32_0 : i32, i32
  }
  func.func @transform_4(%arg0: i32) -> (i32, i32) {
    %c0_i32 = arith.constant 0 : i32
    %c0_i32_0 = arith.constant 0 : i32
    return %arg0, %c0_i32 : i32, i32
  }
}

</mosaic_0001>

<bundles_post_ra>
// kernel: tile.23
= control target key start
LH: loop header
LB: loop body
LE: loop exit
PB: predicated region body
PF: predicated region fallthrough
CT: control target
= control target key end

     0   :  { %s112_s0 = inlined_call_operand.vmem [shape: f32[3], index: 0, kind: input, shape index: {}]   ;;  %s113_s1 = inlined_call_operand.vmem [shape: f32[128,3], index: 1, kind: output, shape index: {}]  }
   0x1   :  { %v4_v0 = vld [vmem:[%s112_s0] ss:$0 sm:$0xff] }
   0x2   :  { %5 = vst [vmem:[%s113_s1] sm:$0xff] %v4_v0 }
   0x3   :  { %36 = vst [vmem:[%s113_s1 + $0x8] sm:$0xff] %v4_v0 }
   0x4   :  { %37 = vst [vmem:[%s113_s1 + $0x10] sm:$0xff] %v4_v0 }
   0x5   :  { %38 = vst [vmem:[%s113_s1 + $0x18] sm:$0xff] %v4_v0 }
   0x6   :  { %39 = vst [vmem:[%s113_s1 + $0x20] sm:$0xff] %v4_v0 }
   0x7   :  { %40 = vst [vmem:[%s113_s1 + $0x28] sm:$0xff] %v4_v0 }
   0x8   :  { %41 = vst [vmem:[%s113_s1 + $0x30] sm:$0xff] %v4_v0 }
   0x9   :  { %42 = vst [vmem:[%s113_s1 + $0x38] sm:$0xff] %v4_v0 }
   0xa   :  { %43 = vst [vmem:[%s113_s1 + $0x40] sm:$0xff] %v4_v0 }
   0xb   :  { %44 = vst [vmem:[%s113_s1 + $0x48] sm:$0xff] %v4_v0 }
   0xc   :  { %45 = vst [vmem:[%s113_s1 + $0x50] sm:$0xff] %v4_v0 }
   0xd   :  { %46 = vst [vmem:[%s113_s1 + $0x58] sm:$0xff] %v4_v0 }
   0xe   :  { %47 = vst [vmem:[%s113_s1 + $0x60] sm:$0xff] %v4_v0 }
   0xf   :  { %48 = vst [vmem:[%s113_s1 + $0x68] sm:$0xff] %v4_v0 }
  0x10   :  { %49 = vst [vmem:[%s113_s1 + $0x70] sm:$0xff] %v4_v0 }
  0x11   :  { %50 = vst [vmem:[%s113_s1 + $0x78] sm:$0xff] %v4_v0 }

// kernel: fuzzy_logic_layer.1
= control target key start
LH: loop header
LB: loop body
LE: loop exit
PB: predicated region body
PF: predicated region fallthrough
CT: control target
= control target key end

     0   :  { %s160_s17 = smov 127   ;;  %s161_s18 = smov 2   ;;  %v31_v9 = vlaneseq  ;;  %vm75_vm4 = vcmask 1040384   ;;  %vm77_vm5 = vcmask 1041408   ;;  %s234_s0 = inlined_call_operand.vmem [shape: f32[1,384], index: 0, kind: input, shape index: {}]   ;;  %s235_s1 = inlined_call_operand.vmem [shape: f32[1,384], index: 1, kind: input, shape index: {}]   ;;  %s236_s2 = inlined_call_operand.vmem [shape: f32[1,384], index: 2, kind: input, shape index: {}]   ;;  %s237_s3 = inlined_call_operand.vmem [shape: f32[1,384], index: 3, kind: input, shape index: {}]   ;;  %s238_s4 = inlined_call_operand.vmem [shape: f32[1,384], index: 4, kind: output, shape index: {}]  }
   0x1   :  { %v192_v0 = vld [vmem:[%s234_s0] sm:$0x7]  ;;  %s162_s19 = smov 126   ;;  %s163_s20 = smov 1  }
   0x2   :  { %v20_v1 = vperm.slane %v192_v0, 1  ;;  %v19_v2 = vperm.slane %v192_v0, 0  ;;  %v21_v3 = vperm.slane %v192_v0, 2  ;;  %v32_v12 = vand.u32 127, %v31_v9  ;;  %v67_v25 = vld [vmem:[%s235_s1] sm:$0x7] }
   0x3   :  { %vm69_vm6 = vcmp.eq.f32.partialorder %v67_v25, 1.0  ;;  %vm68_vm7 = vcmp.eq.f32.partialorder %v67_v25, 0.0  ;;  %vm141_vm12 = vcmp.lt.s32.totalorder %v31_v9, 384 }
   0x4   :  { %27 = vrot.lane.b32.xlu0 %v20_v1, %s160_s17  ;;  %57 = vrot.lane.b32.xlu1 %v19_v2, %s161_s18  ;;  %vm53_vm0 = vcmp.lt.s32.totalorder %v32_v12, 1  ;;  %vm33_vm1 = vcmp.lt.s32.totalorder %v32_v12, 127  ;;  %vm63_vm2 = vcmp.lt.s32.totalorder %v32_v12, 2  ;;  %vm43_vm3 = vcmp.lt.s32.totalorder %v32_v12, 126  ;;  %v137_v12 = vld [vmem:[%s237_s3] sm:$0x7] }
   0x5   :  { %25 = vrot.lane.b32.xlu2 %v19_v2, %s160_s17 }
   0xc   :  { %29 = vrot.lane.b32.xlu0 %v21_v3, %s160_s17  ;;  %59 = vrot.lane.b32.xlu1 %v20_v1, %s161_s18 }
   0xd   :  { %39 = vrot.lane.b32.xlu2 %v20_v1, %s162_s19 }
  0x14   :  { %41 = vrot.lane.b32.xlu0 %v21_v3, %s162_s19  ;;  %47 = vrot.lane.b32.xlu1 %v19_v2, %s163_s20 }
  0x15   :  { %49 = vrot.lane.b32.xlu2 %v20_v1, %s163_s20 }
  0x1c   :  { %61 = vrot.lane.b32.xlu0 %v21_v3, %s161_s18  ;;  %37 = vrot.lane.b32.xlu1 %v19_v2, %s162_s19 }
  0x1d   :  { %51 = vrot.lane.b32.xlu2 %v21_v3, %s163_s20 }
  0x5f   :  { %v26_v4 = vpop.permute.xlu2 %25 }
  0x67   :  { %v40_v5 = vpop.permute.xlu2 %39 }
  0x6f   :  { %v50_v8 = vpop.permute.xlu2 %49 }
  0x76   :  { %v28_v6 = vpop.permute.xlu0 %27  ;;  %v58_v7 = vpop.permute.xlu1 %57 }
  0x77   :  { %v52_v17 = vpop.permute.xlu2 %51  ;;  %v35_v26 = vsel %vm33_vm1, %v26_v4, %v28_v6 }
  0x78   :  { %v54_v21 = vsel %vm53_vm0, %v50_v8, %v52_v17 }
  0x79   :  { %v84_v28 = vrot.slane %v54_v21, 6 }
  0x7e   :  { %v30_v10 = vpop.permute.xlu0 %29  ;;  %v60_v11 = vpop.permute.xlu1 %59 }
  0x7f   :  { %v34_v15 = vsel %vm33_vm1, %v28_v6, %v30_v10  ;;  %v36_v18 = vsel %vm33_vm1, %v30_v10, %v26_v4  ;;  %v65_v22 = vsel %vm63_vm2, %v58_v7, %v60_v11 }
  0x80   :  { %v73_v19 = vrot.slane %v34_v15, 7  ;;  %v74_v27 = vrot.slane %v36_v18, 6  ;;  %v92_v30 = vrot.slane %v65_v22, 7 }
  0x82   :  { %v76_v29 = vsel %vm75_vm4, %v35_v26, %v73_v19 }
  0x83   :  { %v78_v44 = vsel %vm77_vm5, %v76_v29, %v74_v27 }
  0x86   :  { %v42_v13 = vpop.permute.xlu0 %41  ;;  %v48_v14 = vpop.permute.xlu1 %47 }
  0x87   :  { %v55_v16 = vsel %vm53_vm0, %v48_v14, %v50_v8  ;;  %v44_v23 = vsel %vm43_vm3, %v40_v5, %v42_v13  ;;  %v56_v24 = vsel %vm53_vm0, %v52_v17, %v48_v14  ;;  %v135_v8 = vld [vmem:[%s236_s2] sm:$0x7] }
  0x88   :  { %v83_v20 = vrot.slane %v55_v16, 7  ;;  %v101_v31 = vrot.slane %v44_v23, 7 }
  0x8a   :  { %v85_v32 = vsel %vm75_vm4, %v56_v24, %v83_v20 }
  0x8b   :  { %v86_v43 = vsel %vm77_vm5, %v85_v32, %v84_v28 }
  0x8c   :  { %v88_v48 = vsel %vm68_vm7, %v78_v44, %v86_v43 }
  0x8e   :  { %v62_v33 = vpop.permute.xlu0 %61  ;;  %v38_v34 = vpop.permute.xlu1 %37 }
  0x8f   :  { %v64_v35 = vsel %vm63_vm2, %v60_v11, %v62_v33  ;;  %v66_v36 = vsel %vm63_vm2, %v62_v33, %v58_v7  ;;  %v45_v37 = vsel %vm43_vm3, %v38_v34, %v40_v5  ;;  %v46_v38 = vsel %vm43_vm3, %v42_v13, %v38_v34 }
  0x90   :  { %v93_v39 = vrot.slane %v64_v35, 6  ;;  %v94_v40 = vsel %vm75_vm4, %v66_v36, %v92_v30  ;;  %v102_v41 = vrot.slane %v46_v38, 6  ;;  %v103_v42 = vsel %vm75_vm4, %v45_v37, %v101_v31 }
  0x92   :  { %v95_v45 = vsel %vm77_vm5, %v94_v40, %v93_v39  ;;  %v104_v46 = vsel %vm77_vm5, %v103_v42, %v102_v41 }
  0x93   :  { %v97_v47 = vsel %vm69_vm6, %v78_v44, %v95_v45 }
  0x94   :  { %v106_v49 = vsel %vm68_vm7, %v104_v46, %v97_v47 }
  0x95   :  { %v107_v50 = vmax.f32 %v88_v48, %v106_v49 }
  0x97   :  { %v108_v51 = vmax.f32 %v192_v0, %v107_v50 }
  0x99   :  { %v109_v52 = vsub.f32 %v192_v0, %v108_v51  ;;  %v112_v53 = vsub.f32 %v88_v48, %v108_v51  ;;  %v116_v54 = vsub.f32 %v106_v49, %v108_v51 }
  0x9b   :  { %v110_v55 = vmul.f32 1.442695, %v109_v52  ;;  %v113_v56 = vmul.f32 1.442695, %v112_v53  ;;  %v117_v57 = vmul.f32 1.442695, %v116_v54 }
  0x9d   :  { %152 = vpow2.f32 %v110_v55 }
  0x9e   :  { %154 = vpow2.f32 %v113_v56 }
  0x9f   :  { %156 = vpow2.f32 %v117_v57 }
  0xa3   :  { %v153_v58 = vpop.eup %152 }
  0xa4   :  { %v155_v59 = vpop.eup %154 }
  0xa5   :  { %v115_v60 = vadd.f32 %v155_v59, %v153_v58  ;;  %v157_v61 = vpop.eup %156 }
  0xa7   :  { %v119_v62 = vadd.f32 %v157_v61, %v115_v60 }
  0xa9   :  { %158 = vrcp.f32 %v119_v62  ;;  %v131_v3 = vand.u32 2147483648, %v119_v62  ;;  %v129_v0 = vand.u32 2147483647, %v119_v62  ;;  %vm125_vm9 = vweird.f32 %v119_v62 }
  0xab   :  { %v132_v6 = vor.u32 1.1754944e-38, %v131_v3  ;;  %vm130_vm11 = vcmp.eq.f32.partialorder %v129_v0, 8.507059e+37 }
  0xaf   :  { %v159_v63 = vpop.eup %158 }
  0xb0   :  { %v121_v1 = vmul.f32 %v159_v63, %v119_v62  ;;  %vm126_vm8 = vweird.f32 %v159_v63 }
  0xb1   :  { %vm127_vm10 = vmor %vm125_vm9, %vm126_vm8 }
  0xb2   :  { %v122_v2 = vsub.f32 1.0, %v121_v1 }
  0xb4   :  { %v123_v4 = vmul.f32 %v159_v63, %v122_v2 }
  0xb6   :  { %v124_v5 = vadd.f32 %v159_v63, %v123_v4 }
  0xb8   :  { %v128_v7 = vsel %vm127_vm10, %v159_v63, %v124_v5 }
  0xb9   :  { %v133_v10 = vsel %vm130_vm11, %v132_v6, %v128_v7 }
  0xba   :  { %v134_v11 = vmul.f32 %v153_v58, %v133_v10 }
  0xbc   :  { %v136_v13 = vmul.f32 %v135_v8, %v134_v11 }
  0xbe   :  { %v138_v14 = vadd.f32 %v137_v12, %v136_v13 }
  0xc0   :  { %143 = vst.msk [vmem:[%s238_s4] sm:$0x7] %vm141_vm12, %v138_v14 }

</bundles_post_ra>
